<compile_context>
chip_gen: v6e
topology: v6e:2x2x1
jax: 0.10.0
libtpu: 0.0.40
codegen_flags: <defaults>
</compile_context>

<pallas_src>
import functools

import jax
import jax.numpy as jnp
import numpy as np
from jax import lax
from jax.experimental import pallas as pl
from jax.experimental.pallas import tpu as pltpu


# ----------------------------------------------------------------------------
# Fully fused backbone kernel: (Conv3x3 pad=1 + bias + ReLU + MaxPool2x2) x L,
# one image per grid step, all layers inside a single kernel body.
# ----------------------------------------------------------------------------
def _make_fused_backbone_kernel(layer_dims):
    """layer_dims: tuple of (H, W, Cin, Cout) per layer (static)."""
    L = len(layer_dims)

    def kernel(*refs):
        x_ref = refs[0]
        layer_refs = [refs[1 + 3 * l: 1 + 3 * (l + 1)] for l in range(L)]
        o_ref = refs[1 + 3 * L]
        pad_refs = refs[2 + 3 * L: 2 + 3 * L + L]

        cur = x_ref[0]                                      # (H0, W0*Cin0) f32
        for l, (H, W, Cin, Cout) in enumerate(layer_dims):
            m_ref, b_ref, sr_ref = layer_refs[l]
            pad = pad_refs[l]                               # (H+2, (W+2)*Cin) f32

            # Zero-padded image built entirely in VMEM (no HBM im2col / patch
            # matrix).  Re-zeroed every step so megacore sharding of the batch
            # axis stays correct (scratch is per-core).
            pad[...] = jnp.zeros_like(pad)
            pad[1:H + 1, Cin:(W + 1) * Cin] = cur

            # Conv as banded matmuls: m_ref[2*dh + p] maps one padded input row
            # slab to the even (p=0) / odd (p=1) conv output columns.  bf16 MXU
            # operands, f32 accumulation.
            lhs = pad[0:H, :].astype(jnp.bfloat16)          # (H, (W+2)*Cin)
            acc_e = jnp.dot(lhs, m_ref[0], preferred_element_type=jnp.float32)
            acc_o = jnp.dot(lhs, m_ref[1], preferred_element_type=jnp.float32)
            for dh in (1, 2):
                lhs = pad[dh:dh + H, :].astype(jnp.bfloat16)
                acc_e = acc_e + jnp.dot(lhs, m_ref[2 * dh],
                                        preferred_element_type=jnp.float32)
                acc_o = acc_o + jnp.dot(lhs, m_ref[2 * dh + 1],
                                        preferred_element_type=jnp.float32)

            # Fused bias + ReLU + W-direction pool (f32 epilogue):
            #   max(relu(a + b), relu(c + b)) == relu(max(a, c) + b)
            t = jnp.maximum(jnp.maximum(acc_e, acc_o) + b_ref[...], 0.0)
            tb = t.astype(jnp.bfloat16)                     # (H, Wo*Cout)

            # H-direction pool: rows 2i vs 2i+1 picked by two tiny 0/1 selection
            # matrices -> pure MXU work, no strided sublane slicing.
            p0 = jnp.dot(sr_ref[0], tb, preferred_element_type=jnp.float32)
            p1 = jnp.dot(sr_ref[1], tb, preferred_element_type=jnp.float32)
            cur = jnp.maximum(p0, p1)                       # (Ho, Wo*Cout) f32

        o_ref[0] = cur.astype(o_ref.dtype)

    return kernel


def fused_backbone(x3, layer_consts, layer_dims):
    """x3: (B, H0, W0*Cin0) NHWC-flat f32 -> (B, Ho_last, Wo_last*Cout_last) f32."""
    B = x3.shape[0]
    H_last, W_last, _, Cout_last = layer_dims[-1]
    Ho_last, Wo_last = H_last // 2, W_last // 2
    N_last = Wo_last * Cout_last

    in_specs = [pl.BlockSpec((1,) + tuple(x3.shape[1:]), lambda b: (b, 0, 0))]
    operands = [x3]
    for (m, brow, sr) in layer_consts:
        # Constant operands: same block every grid step -> stay resident in VMEM,
        # no per-step DMA.
        in_specs.append(pl.BlockSpec(tuple(m.shape), lambda b: (0, 0, 0)))
        in_specs.append(pl.BlockSpec(tuple(brow.shape), lambda b: (0, 0)))
        in_specs.append(pl.BlockSpec(tuple(sr.shape), lambda b: (0, 0, 0)))
        operands += [m, brow, sr]

    scratch = [pltpu.VMEM((H + 2, (W + 2) * Cin), jnp.float32)
               for (H, W, Cin, Cout) in layer_dims]

    kernel = _make_fused_backbone_kernel(tuple(layer_dims))
    return pl.pallas_call(
        kernel,
        out_shape=jax.ShapeDtypeStruct((B, Ho_last, N_last), jnp.float32),
        grid_spec=pltpu.PrefetchScalarGridSpec(
            num_scalar_prefetch=0,
            grid=(B,),
            in_specs=in_specs,
            out_specs=pl.BlockSpec((1, Ho_last, N_last), lambda b: (b, 0, 0)),
            scratch_shapes=scratch,
        ),
        compiler_params=pltpu.CompilerParams(
            dimension_semantics=("parallel",)),
    )(*operands)


# ----------------------------------------------------------------------------
# Feature backbone (the `model_func()` instance) and MetaTemplate
# ----------------------------------------------------------------------------
class ConvNetFeature:
    """Conv3x3 -> BN(identity at default init, eval mode) -> ReLU -> MaxPool2x2, x2.

    All per-layer constants (banded conv matrices, bias rows, pool row-selectors)
    are precomputed once here (hoisted out of forward)."""

    def __init__(self, in_ch, hidden_chs, spatial):
        key = jax.random.PRNGKey(0)
        self.weights = []      # torch OIHW layout, kept for the reference check
        self.biases = []
        self.layer_dims = []   # (H, W, Cin, Cout) per layer
        self.layer_consts = []
        c_in = in_ch
        s = spatial
        for c_out in hidden_chs:
            key, kw, kb = jax.random.split(key, 3)
            fan_in = c_in * 9
            w = jax.random.normal(kw, (c_out, c_in, 3, 3), jnp.float32) * (
                1.0 / np.sqrt(fan_in))
            b = jax.random.normal(kb, (c_out,), jnp.float32) * 0.01
            self.weights.append(w)
            self.biases.append(b)
            self.layer_consts.append(self._precompute_layer(w, b, H=s, W=s))
            self.layer_dims.append((s, s, c_in, c_out))
            c_in = c_out
            s //= 2
        self.final_feat_dim = c_in * s * s
        self._out_chw = (c_in, s, s)
        # jit hoists trace overhead and fuses the boundary transposes/reshapes.
        self._forward_jit = jax.jit(self._forward_impl)

    @staticmethod
    def _precompute_layer(w_oihw, b, H, W):
        # TODO(synk): odd spatial sizes (e.g. 21 in deeper backbones) would need a
        # floor-pool edge case like PyTorch MaxPool2d; only even H/W supported here.
        assert H % 2 == 0 and W % 2 == 0
        c_out, c_in = int(w_oihw.shape[0]), int(w_oihw.shape[1])
        Ho, Wo = H // 2, W // 2
        K = (W + 2) * c_in
        N = Wo * c_out
        wn = np.asarray(w_oihw, np.float32)
        # Banded conv matrices: m[2*dh + parity] @ padded-row-slab -> conv output
        # columns of that parity, laid out as (w_out, c_out) on lanes.
        m = np.zeros((6, K, N), np.float32)
        for dh in range(3):
            for parity in range(2):
                for j in range(Wo):
                    wout = 2 * j + parity            # conv output column
                    for dw in range(3):
                        win = wout + dw              # padded input column
                        m[2 * dh + parity,
                          win * c_in:(win + 1) * c_in,
                          j * c_out:(j + 1) * c_out] += wn[:, :, dh, dw].T
        # Row selectors for the H-direction of the 2x2 max pool.
        sr = np.zeros((2, Ho, H), np.float32)
        for parity in range(2):
            sr[parity, np.arange(Ho), 2 * np.arange(Ho) + parity] = 1.0
        bias_row = np.tile(np.asarray(b, np.float32), Wo).reshape(1, N)
        return (jnp.asarray(m, jnp.bfloat16),
                jnp.asarray(bias_row, jnp.float32),
                jnp.asarray(sr, jnp.bfloat16))

    def _forward_impl(self, x_nchw):
        B = x_nchw.shape[0]
        # NCHW -> NHWC-flat (B, H, W*C); f32 into the fused kernel (bf16 only at
        # the MXU operands inside the kernel).
        x = jnp.transpose(x_nchw, (0, 2, 3, 1)).astype(jnp.float32)
        x = x.reshape(B, x.shape[1], -1)
        y = fused_backbone(x, self.layer_consts, self.layer_dims)
        # NHWC-flat -> NCHW flatten (matches torch .view(B, -1) ordering)
        cf, hf, wf = self._out_chw
        y = y.reshape(B, hf, wf, cf)
        y = jnp.transpose(y, (0, 3, 1, 2))
        return y.reshape(B, -1)

    def forward(self, x_nchw):
        return self._forward_jit(x_nchw)


class MetaTemplate:
    def __init__(self, model_func, n_way, n_support, change_way=True):
        self.n_way = n_way
        self.n_support = n_support
        self.n_query = -1
        self.feature = model_func()
        self.feat_dim = self.feature.final_feat_dim
        self.change_way = change_way

    def forward(self, x):
        # forward() == feature.forward(x)
        return self.feature.forward(x)

    def parse_feature(self, x, is_feature):
        # glue-only (reshape/slice); included for fidelity
        if is_feature:
            z_all = x
        else:
            x = x.reshape((self.n_way * (self.n_support + self.n_query),) + x.shape[2:])
            z_all = self.feature.forward(x)
            z_all = z_all.reshape(self.n_way, self.n_support + self.n_query, -1)
        z_support = z_all[:, :self.n_support]
        z_query = z_all[:, self.n_support:]
        return z_support, z_query

    # TODO(synk): set_forward / set_forward_loss are abstract in the PyTorch module;
    # correct / train_loop / test_loop / set_forward_adaptation are host-side
    # optimizer/data-loader loops with no Pallas equivalent and are not translated.


# ----------------------------------------------------------------------------
# Reference (pure jnp, fp32) for a sanity check
# ----------------------------------------------------------------------------
def reference_forward(feature, x_nchw):
    x = x_nchw.astype(jnp.float32)
    for w, b in zip(feature.weights, feature.biases):
        y = lax.conv_general_dilated(
            x, w, window_strides=(1, 1), padding=((1, 1), (1, 1)),
            dimension_numbers=("NCHW", "OIHW", "NCHW"))
        y = jnp.maximum(y + b[None, :, None, None], 0.0)
        x = lax.reduce_window(y, -jnp.inf, lax.max,
                              (1, 1, 2, 2), (1, 1, 2, 2), "VALID")
    return x.reshape(x.shape[0], -1)


# ----------------------------------------------------------------------------
if __name__ == "__main__":
    B, C, H, W = 2, 4, 16, 16
    key = jax.random.PRNGKey(0)
    x = jax.random.normal(key, (B, C, H, W), jnp.float32)

    model = MetaTemplate(
        model_func=functools.partial(ConvNetFeature, in_ch=C,
                                     hidden_chs=(8, 16), spatial=H),
        n_way=2, n_support=1)

    out = model.forward(x)
    out = jax.block_until_ready(out)

    assert out.shape == (B, model.feat_dim), (out.shape, model.feat_dim)

    ref = jax.block_until_ready(reference_forward(model.feature, x))
    # bf16 MXU operands -> slightly looser tolerance than the all-f32 reference.
    if not np.allclose(np.asarray(out), np.asarray(ref), atol=5e-2, rtol=5e-2):
        raise AssertionError("Pallas kernel output mismatch vs reference")

    print("KERNEL_OK")
</pallas_src>

<mosaic_0001>
module attributes {stable_mosaic.version = 11 : i64} {
  func.func @kernel(%arg0: i32, %arg1: memref<1x16x64xf32, #tpu.memory_space<vmem>>, %arg2: memref<6x72x64xbf16, #tpu.memory_space<vmem>>, %arg3: memref<1x64xf32, #tpu.memory_space<vmem>>, %arg4: memref<2x8x16xbf16, #tpu.memory_space<vmem>>, %arg5: memref<6x80x64xbf16, #tpu.memory_space<vmem>>, %arg6: memref<1x64xf32, #tpu.memory_space<vmem>>, %arg7: memref<2x4x8xbf16, #tpu.memory_space<vmem>>, %arg8: memref<1x4x64xf32, #tpu.memory_space<vmem>>, %arg9: memref<18x72xf32, #tpu.memory_space<vmem>>, %arg10: memref<10x80xf32, #tpu.memory_space<vmem>>) attributes {dimension_semantics = [#tpu.dimension_semantics<parallel>], iteration_bounds = array<i64: 2>, scalar_prefetch = 0 : i64, scratch_operands = 2 : i64, tpu.core_type = #tpu.core_type<tc>, window_params = [{transform_indices = @transform_0, window_bounds = array<i64: 1, 16, 64>}, {pipeline_mode = #tpu.pipeline_mode<synchronous>, transform_indices = @transform_1, window_bounds = array<i64: 6, 72, 64>}, {pipeline_mode = #tpu.pipeline_mode<synchronous>, transform_indices = @transform_2, window_bounds = array<i64: 1, 64>}, {pipeline_mode = #tpu.pipeline_mode<synchronous>, transform_indices = @transform_3, window_bounds = array<i64: 2, 8, 16>}, {pipeline_mode = #tpu.pipeline_mode<synchronous>, transform_indices = @transform_4, window_bounds = array<i64: 6, 80, 64>}, {pipeline_mode = #tpu.pipeline_mode<synchronous>, transform_indices = @transform_5, window_bounds = array<i64: 1, 64>}, {pipeline_mode = #tpu.pipeline_mode<synchronous>, transform_indices = @transform_6, window_bounds = array<i64: 2, 4, 8>}, {transform_indices = @transform_7, window_bounds = array<i64: 1, 4, 64>}]} {
    %c0 = arith.constant 0 : index
    %c0_0 = arith.constant 0 : index
    %c0_1 = arith.constant 0 : index
    %0 = vector.load %arg1[%c0, %c0_0, %c0_1] : memref<1x16x64xf32, #tpu.memory_space<vmem>>, vector<1x16x64xf32>
    %1 = vector.shape_cast %0 : vector<1x16x64xf32> to vector<16x64xf32>
    %cst = arith.constant 0.000000e+00 : f32
    %2 = vector.broadcast %cst : f32 to vector<18x72xf32>
    %c0_2 = arith.constant 0 : index
    %c0_3 = arith.constant 0 : index
    %3 = vector.load %arg9[%c0_2, %c0_3] : memref<18x72xf32, #tpu.memory_space<vmem>>, vector<18x72xf32>
    tpu.vector_store %arg9[%c0_2, %c0_3], %2 {strides = array<i32>} : memref<18x72xf32, #tpu.memory_space<vmem>>, vector<18x72xf32>,
    %c1 = arith.constant 1 : index
    %c4 = arith.constant 4 : index
    %4 = vector.load %arg9[%c1, %c4] : memref<18x72xf32, #tpu.memory_space<vmem>>, vector<16x64xf32>
    tpu.vector_store %arg9[%c1, %c4], %1 {strides = array<i32>} : memref<18x72xf32, #tpu.memory_space<vmem>>, vector<16x64xf32>,
    %c0_4 = arith.constant 0 : index
    %c0_5 = arith.constant 0 : index
    %5 = vector.load %arg9[%c0_4, %c0_5] : memref<18x72xf32, #tpu.memory_space<vmem>>, vector<16x72xf32>
    %6 = arith.truncf %5 : vector<16x72xf32> to vector<16x72xbf16>
    %c0_6 = arith.constant 0 : index
    %c0_7 = arith.constant 0 : index
    %c0_8 = arith.constant 0 : index
    %7 = vector.load %arg2[%c0_6, %c0_7, %c0_8] : memref<6x72x64xbf16, #tpu.memory_space<vmem>>, vector<1x72x64xbf16>
    %8 = vector.shape_cast %7 : vector<1x72x64xbf16> to vector<72x64xbf16>
    %cst_9 = arith.constant dense<0.000000e+00> : vector<16x64xf32>
    %9 = tpu.matmul %6, %8, %cst_9 {dimension_numbers = #tpu.dot_dimension_numbers<[1], [0], [0], [1], [0, 0, 1, 1], [], []>} : vector<16x72xbf16>, vector<72x64xbf16>, vector<16x64xf32> -> vector<16x64xf32>
    %c1_10 = arith.constant 1 : index
    %c0_11 = arith.constant 0 : index
    %c0_12 = arith.constant 0 : index
    %10 = vector.load %arg2[%c1_10, %c0_11, %c0_12] : memref<6x72x64xbf16, #tpu.memory_space<vmem>>, vector<1x72x64xbf16>
    %11 = vector.shape_cast %10 : vector<1x72x64xbf16> to vector<72x64xbf16>
    %cst_13 = arith.constant dense<0.000000e+00> : vector<16x64xf32>
    %12 = tpu.matmul %6, %11, %cst_13 {dimension_numbers = #tpu.dot_dimension_numbers<[1], [0], [0], [1], [0, 0, 1, 1], [], []>} : vector<16x72xbf16>, vector<72x64xbf16>, vector<16x64xf32> -> vector<16x64xf32>
    %c1_14 = arith.constant 1 : index
    %c0_15 = arith.constant 0 : index
    %13 = vector.load %arg9[%c1_14, %c0_15] : memref<18x72xf32, #tpu.memory_space<vmem>>, vector<16x72xf32>
    %14 = arith.truncf %13 : vector<16x72xf32> to vector<16x72xbf16>
    %c2 = arith.constant 2 : index
    %c0_16 = arith.constant 0 : index
    %c0_17 = arith.constant 0 : index
    %15 = vector.load %arg2[%c2, %c0_16, %c0_17] : memref<6x72x64xbf16, #tpu.memory_space<vmem>>, vector<1x72x64xbf16>
    %16 = vector.shape_cast %15 : vector<1x72x64xbf16> to vector<72x64xbf16>
    %cst_18 = arith.constant dense<0.000000e+00> : vector<16x64xf32>
    %17 = tpu.matmul %14, %16, %cst_18 {dimension_numbers = #tpu.dot_dimension_numbers<[1], [0], [0], [1], [0, 0, 1, 1], [], []>} : vector<16x72xbf16>, vector<72x64xbf16>, vector<16x64xf32> -> vector<16x64xf32>
    %18 = arith.addf %9, %17 : vector<16x64xf32>
    %c3 = arith.constant 3 : index
    %c0_19 = arith.constant 0 : index
    %c0_20 = arith.constant 0 : index
    %19 = vector.load %arg2[%c3, %c0_19, %c0_20] : memref<6x72x64xbf16, #tpu.memory_space<vmem>>, vector<1x72x64xbf16>
    %20 = vector.shape_cast %19 : vector<1x72x64xbf16> to vector<72x64xbf16>
    %cst_21 = arith.constant dense<0.000000e+00> : vector<16x64xf32>
    %21 = tpu.matmul %14, %20, %cst_21 {dimension_numbers = #tpu.dot_dimension_numbers<[1], [0], [0], [1], [0, 0, 1, 1], [], []>} : vector<16x72xbf16>, vector<72x64xbf16>, vector<16x64xf32> -> vector<16x64xf32>
    %22 = arith.addf %12, %21 : vector<16x64xf32>
    %c2_22 = arith.constant 2 : index
    %c0_23 = arith.constant 0 : index
    %23 = vector.load %arg9[%c2_22, %c0_23] : memref<18x72xf32, #tpu.memory_space<vmem>>, vector<16x72xf32>
    %24 = arith.truncf %23 : vector<16x72xf32> to vector<16x72xbf16>
    %c4_24 = arith.constant 4 : index
    %c0_25 = arith.constant 0 : index
    %c0_26 = arith.constant 0 : index
    %25 = vector.load %arg2[%c4_24, %c0_25, %c0_26] : memref<6x72x64xbf16, #tpu.memory_space<vmem>>, vector<1x72x64xbf16>
    %26 = vector.shape_cast %25 : vector<1x72x64xbf16> to vector<72x64xbf16>
    %cst_27 = arith.constant dense<0.000000e+00> : vector<16x64xf32>
    %27 = tpu.matmul %24, %26, %cst_27 {dimension_numbers = #tpu.dot_dimension_numbers<[1], [0], [0], [1], [0, 0, 1, 1], [], []>} : vector<16x72xbf16>, vector<72x64xbf16>, vector<16x64xf32> -> vector<16x64xf32>
    %28 = arith.addf %18, %27 : vector<16x64xf32>
    %c5 = arith.constant 5 : index
    %c0_28 = arith.constant 0 : index
    %c0_29 = arith.constant 0 : index
    %29 = vector.load %arg2[%c5, %c0_28, %c0_29] : memref<6x72x64xbf16, #tpu.memory_space<vmem>>, vector<1x72x64xbf16>
    %30 = vector.shape_cast %29 : vector<1x72x64xbf16> to vector<72x64xbf16>
    %cst_30 = arith.constant dense<0.000000e+00> : vector<16x64xf32>
    %31 = tpu.matmul %24, %30, %cst_30 {dimension_numbers = #tpu.dot_dimension_numbers<[1], [0], [0], [1], [0, 0, 1, 1], [], []>} : vector<16x72xbf16>, vector<72x64xbf16>, vector<16x64xf32> -> vector<16x64xf32>
    %32 = arith.addf %22, %31 : vector<16x64xf32>
    %33 = arith.maximumf %28, %32 : vector<16x64xf32>
    %c0_31 = arith.constant 0 : index
    %c0_32 = arith.constant 0 : index
    %34 = vector.load %arg3[%c0_31, %c0_32] : memref<1x64xf32, #tpu.memory_space<vmem>>, vector<1x64xf32>
    %35 = vector.broadcast %34 : vector<1x64xf32> to vector<16x64xf32>
    %36 = arith.addf %33, %35 : vector<16x64xf32>
    %cst_33 = arith.constant 0.000000e+00 : f32
    %37 = vector.broadcast %cst_33 : f32 to vector<16x64xf32>
    %38 = arith.maximumf %36, %37 : vector<16x64xf32>
    %39 = arith.truncf %38 : vector<16x64xf32> to vector<16x64xbf16>
    %c0_34 = arith.constant 0 : index
    %c0_35 = arith.constant 0 : index
    %c0_36 = arith.constant 0 : index
    %40 = vector.load %arg4[%c0_34, %c0_35, %c0_36] : memref<2x8x16xbf16, #tpu.memory_space<vmem>>, vector<1x8x16xbf16>
    %41 = vector.shape_cast %40 : vector<1x8x16xbf16> to vector<8x16xbf16>
    %cst_37 = arith.constant dense<0.000000e+00> : vector<8x64xf32>
    %42 = tpu.matmul %41, %39, %cst_37 {dimension_numbers = #tpu.dot_dimension_numbers<[1], [0], [0], [1], [0, 0, 1, 1], [], []>} : vector<8x16xbf16>, vector<16x64xbf16>, vector<8x64xf32> -> vector<8x64xf32>
    %c1_38 = arith.constant 1 : index
    %c0_39 = arith.constant 0 : index
    %c0_40 = arith.constant 0 : index
    %43 = vector.load %arg4[%c1_38, %c0_39, %c0_40] : memref<2x8x16xbf16, #tpu.memory_space<vmem>>, vector<1x8x16xbf16>
    %44 = vector.shape_cast %43 : vector<1x8x16xbf16> to vector<8x16xbf16>
    %cst_41 = arith.constant dense<0.000000e+00> : vector<8x64xf32>
    %45 = tpu.matmul %44, %39, %cst_41 {dimension_numbers = #tpu.dot_dimension_numbers<[1], [0], [0], [1], [0, 0, 1, 1], [], []>} : vector<8x16xbf16>, vector<16x64xbf16>, vector<8x64xf32> -> vector<8x64xf32>
    %46 = arith.maximumf %42, %45 : vector<8x64xf32>
    %cst_42 = arith.constant 0.000000e+00 : f32
    %47 = vector.broadcast %cst_42 : f32 to vector<10x80xf32>
    %c0_43 = arith.constant 0 : index
    %c0_44 = arith.constant 0 : index
    %48 = vector.load %arg10[%c0_43, %c0_44] : memref<10x80xf32, #tpu.memory_space<vmem>>, vector<10x80xf32>
    tpu.vector_store %arg10[%c0_43, %c0_44], %47 {strides = array<i32>} : memref<10x80xf32, #tpu.memory_space<vmem>>, vector<10x80xf32>,
    %c1_45 = arith.constant 1 : index
    %c8 = arith.constant 8 : index
    %49 = vector.load %arg10[%c1_45, %c8] : memref<10x80xf32, #tpu.memory_space<vmem>>, vector<8x64xf32>
    tpu.vector_store %arg10[%c1_45, %c8], %46 {strides = array<i32>} : memref<10x80xf32, #tpu.memory_space<vmem>>, vector<8x64xf32>,
    %c0_46 = arith.constant 0 : index
    %c0_47 = arith.constant 0 : index
    %50 = vector.load %arg10[%c0_46, %c0_47] : memref<10x80xf32, #tpu.memory_space<vmem>>, vector<8x80xf32>
    %51 = arith.truncf %50 : vector<8x80xf32> to vector<8x80xbf16>
    %c0_48 = arith.constant 0 : index
    %c0_49 = arith.constant 0 : index
    %c0_50 = arith.constant 0 : index
    %52 = vector.load %arg5[%c0_48, %c0_49, %c0_50] : memref<6x80x64xbf16, #tpu.memory_space<vmem>>, vector<1x80x64xbf16>
    %53 = vector.shape_cast %52 : vector<1x80x64xbf16> to vector<80x64xbf16>
    %cst_51 = arith.constant dense<0.000000e+00> : vector<8x64xf32>
    %54 = tpu.matmul %51, %53, %cst_51 {dimension_numbers = #tpu.dot_dimension_numbers<[1], [0], [0], [1], [0, 0, 1, 1], [], []>} : vector<8x80xbf16>, vector<80x64xbf16>, vector<8x64xf32> -> vector<8x64xf32>
    %c1_52 = arith.constant 1 : index
    %c0_53 = arith.constant 0 : index
    %c0_54 = arith.constant 0 : index
    %55 = vector.load %arg5[%c1_52, %c0_53, %c0_54] : memref<6x80x64xbf16, #tpu.memory_space<vmem>>, vector<1x80x64xbf16>
    %56 = vector.shape_cast %55 : vector<1x80x64xbf16> to vector<80x64xbf16>
    %cst_55 = arith.constant dense<0.000000e+00> : vector<8x64xf32>
    %57 = tpu.matmul %51, %56, %cst_55 {dimension_numbers = #tpu.dot_dimension_numbers<[1], [0], [0], [1], [0, 0, 1, 1], [], []>} : vector<8x80xbf16>, vector<80x64xbf16>, vector<8x64xf32> -> vector<8x64xf32>
    %c1_56 = arith.constant 1 : index
    %c0_57 = arith.constant 0 : index
    %58 = vector.load %arg10[%c1_56, %c0_57] : memref<10x80xf32, #tpu.memory_space<vmem>>, vector<8x80xf32>
    %59 = arith.truncf %58 : vector<8x80xf32> to vector<8x80xbf16>
    %c2_58 = arith.constant 2 : index
    %c0_59 = arith.constant 0 : index
    %c0_60 = arith.constant 0 : index
    %60 = vector.load %arg5[%c2_58, %c0_59, %c0_60] : memref<6x80x64xbf16, #tpu.memory_space<vmem>>, vector<1x80x64xbf16>
    %61 = vector.shape_cast %60 : vector<1x80x64xbf16> to vector<80x64xbf16>
    %cst_61 = arith.constant dense<0.000000e+00> : vector<8x64xf32>
    %62 = tpu.matmul %59, %61, %cst_61 {dimension_numbers = #tpu.dot_dimension_numbers<[1], [0], [0], [1], [0, 0, 1, 1], [], []>} : vector<8x80xbf16>, vector<80x64xbf16>, vector<8x64xf32> -> vector<8x64xf32>
    %63 = arith.addf %54, %62 : vector<8x64xf32>
    %c3_62 = arith.constant 3 : index
    %c0_63 = arith.constant 0 : index
    %c0_64 = arith.constant 0 : index
    %64 = vector.load %arg5[%c3_62, %c0_63, %c0_64] : memref<6x80x64xbf16, #tpu.memory_space<vmem>>, vector<1x80x64xbf16>
    %65 = vector.shape_cast %64 : vector<1x80x64xbf16> to vector<80x64xbf16>
    %cst_65 = arith.constant dense<0.000000e+00> : vector<8x64xf32>
    %66 = tpu.matmul %59, %65, %cst_65 {dimension_numbers = #tpu.dot_dimension_numbers<[1], [0], [0], [1], [0, 0, 1, 1], [], []>} : vector<8x80xbf16>, vector<80x64xbf16>, vector<8x64xf32> -> vector<8x64xf32>
    %67 = arith.addf %57, %66 : vector<8x64xf32>
    %c2_66 = arith.constant 2 : index
    %c0_67 = arith.constant 0 : index
    %68 = vector.load %arg10[%c2_66, %c0_67] : memref<10x80xf32, #tpu.memory_space<vmem>>, vector<8x80xf32>
    %69 = arith.truncf %68 : vector<8x80xf32> to vector<8x80xbf16>
    %c4_68 = arith.constant 4 : index
    %c0_69 = arith.constant 0 : index
    %c0_70 = arith.constant 0 : index
    %70 = vector.load %arg5[%c4_68, %c0_69, %c0_70] : memref<6x80x64xbf16, #tpu.memory_space<vmem>>, vector<1x80x64xbf16>
    %71 = vector.shape_cast %70 : vector<1x80x64xbf16> to vector<80x64xbf16>
    %cst_71 = arith.constant dense<0.000000e+00> : vector<8x64xf32>
    %72 = tpu.matmul %69, %71, %cst_71 {dimension_numbers = #tpu.dot_dimension_numbers<[1], [0], [0], [1], [0, 0, 1, 1], [], []>} : vector<8x80xbf16>, vector<80x64xbf16>, vector<8x64xf32> -> vector<8x64xf32>
    %73 = arith.addf %63, %72 : vector<8x64xf32>
    %c5_72 = arith.constant 5 : index
    %c0_73 = arith.constant 0 : index
    %c0_74 = arith.constant 0 : index
    %74 = vector.load %arg5[%c5_72, %c0_73, %c0_74] : memref<6x80x64xbf16, #tpu.memory_space<vmem>>, vector<1x80x64xbf16>
    %75 = vector.shape_cast %74 : vector<1x80x64xbf16> to vector<80x64xbf16>
    %cst_75 = arith.constant dense<0.000000e+00> : vector<8x64xf32>
    %76 = tpu.matmul %69, %75, %cst_75 {dimension_numbers = #tpu.dot_dimension_numbers<[1], [0], [0], [1], [0, 0, 1, 1], [], []>} : vector<8x80xbf16>, vector<80x64xbf16>, vector<8x64xf32> -> vector<8x64xf32>
    %77 = arith.addf %67, %76 : vector<8x64xf32>
    %78 = arith.maximumf %73, %77 : vector<8x64xf32>
    %c0_76 = arith.constant 0 : index
    %c0_77 = arith.constant 0 : index
    %79 = vector.load %arg6[%c0_76, %c0_77] : memref<1x64xf32, #tpu.memory_space<vmem>>, vector<1x64xf32>
    %80 = vector.broadcast %79 : vector<1x64xf32> to vector<8x64xf32>
    %81 = arith.addf %78, %80 : vector<8x64xf32>
    %cst_78 = arith.constant 0.000000e+00 : f32
    %82 = vector.broadcast %cst_78 : f32 to vector<8x64xf32>
    %83 = arith.maximumf %81, %82 : vector<8x64xf32>
    %84 = arith.truncf %83 : vector<8x64xf32> to vector<8x64xbf16>
    %c0_79 = arith.constant 0 : index
    %c0_80 = arith.constant 0 : index
    %c0_81 = arith.constant 0 : index
    %85 = vector.load %arg7[%c0_79, %c0_80, %c0_81] : memref<2x4x8xbf16, #tpu.memory_space<vmem>>, vector<1x4x8xbf16>
    %86 = vector.shape_cast %85 : vector<1x4x8xbf16> to vector<4x8xbf16>
    %cst_82 = arith.constant dense<0.000000e+00> : vector<4x64xf32>
    %87 = tpu.matmul %86, %84, %cst_82 {dimension_numbers = #tpu.dot_dimension_numbers<[1], [0], [0], [1], [0, 0, 1, 1], [], []>} : vector<4x8xbf16>, vector<8x64xbf16>, vector<4x64xf32> -> vector<4x64xf32>
    %c1_83 = arith.constant 1 : index
    %c0_84 = arith.constant 0 : index
    %c0_85 = arith.constant 0 : index
    %88 = vector.load %arg7[%c1_83, %c0_84, %c0_85] : memref<2x4x8xbf16, #tpu.memory_space<vmem>>, vector<1x4x8xbf16>
    %89 = vector.shape_cast %88 : vector<1x4x8xbf16> to vector<4x8xbf16>
    %cst_86 = arith.constant dense<0.000000e+00> : vector<4x64xf32>
    %90 = tpu.matmul %89, %84, %cst_86 {dimension_numbers = #tpu.dot_dimension_numbers<[1], [0], [0], [1], [0, 0, 1, 1], [], []>} : vector<4x8xbf16>, vector<8x64xbf16>, vector<4x64xf32> -> vector<4x64xf32>
    %91 = arith.maximumf %87, %90 : vector<4x64xf32>
    %c0_87 = arith.constant 0 : index
    %c0_88 = arith.constant 0 : index
    %c0_89 = arith.constant 0 : index
    %92 = vector.load %arg8[%c0_87, %c0_88, %c0_89] : memref<1x4x64xf32, #tpu.memory_space<vmem>>, vector<1x4x64xf32>
    %93 = vector.shape_cast %92 : vector<1x4x64xf32> to vector<4x64xf32>
    %94 = vector.shape_cast %91 : vector<4x64xf32> to vector<1x4x64xf32>
    tpu.vector_store %arg8[%c0_87, %c0_88, %c0_89], %94 {strides = array<i32>} : memref<1x4x64xf32, #tpu.memory_space<vmem>>, vector<1x4x64xf32>,
    return
  }
  func.func @transform_0(%arg0: i32) -> (i32, i32, i32) {
    %c0_i32 = arith.constant 0 : i32
    %c0_i32_0 = arith.constant 0 : i32
    %c0_i32_1 = arith.constant 0 : i32
    return %arg0, %c0_i32, %c0_i32_0 : i32, i32, i32
  }
  func.func @transform_1(%arg0: i32) -> (i32, i32, i32) {
    %c0_i32 = arith.constant 0 : i32
    %c0_i32_0 = arith.constant 0 : i32
    %c0_i32_1 = arith.constant 0 : i32
    %c0_i32_2 = arith.constant 0 : i32
    return %c0_i32, %c0_i32_0, %c0_i32_1 : i32, i32, i32
  }
  func.func @transform_2(%arg0: i32) -> (i32, i32) {
    %c0_i32 = arith.constant 0 : i32
    %c0_i32_0 = arith.constant 0 : i32
    %c0_i32_1 = arith.constant 0 : i32
    return %c0_i32, %c0_i32_0 : i32, i32
  }
  func.func @transform_3(%arg0: i32) -> (i32, i32, i32) {
    %c0_i32 = arith.constant 0 : i32
    %c0_i32_0 = arith.constant 0 : i32
    %c0_i32_1 = arith.constant 0 : i32
    %c0_i32_2 = arith.constant 0 : i32
    return %c0_i32, %c0_i32_0, %c0_i32_1 : i32, i32, i32
  }
  func.func @transform_4(%arg0: i32) -> (i32, i32, i32) {
    %c0_i32 = arith.constant 0 : i32
    %c0_i32_0 = arith.constant 0 : i32
    %c0_i32_1 = arith.constant 0 : i32
    %c0_i32_2 = arith.constant 0 : i32
    return %c0_i32, %c0_i32_0, %c0_i32_1 : i32, i32, i32
  }
  func.func @transform_5(%arg0: i32) -> (i32, i32) {
    %c0_i32 = arith.constant 0 : i32
    %c0_i32_0 = arith.constant 0 : i32
    %c0_i32_1 = arith.constant 0 : i32
    return %c0_i32, %c0_i32_0 : i32, i32
  }
  func.func @transform_6(%arg0: i32) -> (i32, i32, i32) {
    %c0_i32 = arith.constant 0 : i32
    %c0_i32_0 = arith.constant 0 : i32
    %c0_i32_1 = arith.constant 0 : i32
    %c0_i32_2 = arith.constant 0 : i32
    return %c0_i32, %c0_i32_0, %c0_i32_1 : i32, i32, i32
  }
  func.func @transform_7(%arg0: i32) -> (i32, i32, i32) {
    %c0_i32 = arith.constant 0 : i32
    %c0_i32_0 = arith.constant 0 : i32
    %c0_i32_1 = arith.constant 0 : i32
    return %arg0, %c0_i32, %c0_i32_0 : i32, i32, i32
  }
}

</mosaic_0001>

<bundles_post_ra>
// kernel: _forward_impl.1
= control target key start
LH: loop header
LB: loop body
LE: loop exit
PB: predicated region body
PF: predicated region fallthrough
CT: control target
= control target key end

     0   :  { %12 = vsyncpa [#allocation5], 0  ;;  %s2193_s24 = smov 0   ;;  %s2467_s0 = inlined_call_operand.vmem [shape: f32[2,16,64], index: 0, kind: input, shape index: {}]   ;;  %s2468_s1 = inlined_call_operand.hbm [shape: bf16[6,72,64], index: 1, kind: input, shape index: {}]   ;;  %s2469_s2 = inlined_call_operand.vmem [shape: f32[1,64], index: 2, kind: input, shape index: {}]   ;;  %s2470_s3 = inlined_call_operand.vmem [shape: bf16[2,8,16], index: 3, kind: input, shape index: {}]   ;;  %s2471_s4 = inlined_call_operand.vmem [shape: bf16[6,80,64], index: 4, kind: input, shape index: {}]   ;;  %s2472_s5 = inlined_call_operand.vmem [shape: f32[1,64], index: 5, kind: input, shape index: {}]   ;;  %s2473_s6 = inlined_call_operand.vmem [shape: bf16[2,4,8], index: 6, kind: input, shape index: {}]   ;;  %s2474_s7 = inlined_call_operand.vmem [shape: f32[2,4,64], index: 7, kind: output, shape index: {}]  }
   0x1 LB: > { %s2199_s25 = sadd.s32 4294967295, %s2144_s24   ;;  %p1610_p0 = scmp.ge.s32.totalorder %s2144_s24, 1  ;;  %s2144_s24 = sphi %s2193_s24, %s18_s24  }
   0x2   : > { %p201_p1 = scmp.lt.s32.totalorder %s2144_s24, 3  ;;  %s2146_s26 = smov [#allocation4]  }
   0x3   : > { %s213_s27 = sshll.u32 %s2146_s26, 4  ;;  %p2031_p3 = scmp.eq.s32.totalorder %s2199_s25, 0  ;;  %s214_s27 = int_to_ptr.vmem [resolvable:$true] %s213_s27 }
   0x4   : > { %p2203_p2 = pnand %p1610_p0, %p201_p1  ;;  %s2119_s29 = scalar_lea.vmem %s214_s27, 3456 }
   0x5   : > { %p2120_p7 = scmp.ne.s32.totalorder %s214_s27, %s2119_s29  ;;  %p2127_p10 = scmp.lt.s32.totalorder %s214_s27, %s214_s27 }
   0x6   : > { %p2027_p4 = pneg %p2203_p2  ;;  %p2128_p11 = scmp.lt.s32.totalorder %s2119_s29, %s2119_s29 }
   0x8   : > { %p2028_p5 = pnand %p2031_p3, %p2027_p4  ;;  %p2129_p12 = por %p2128_p11, %p2127_p10 }
   0xa   : > { %p2110_p6 = pneg %p2028_p5 }
   0xc   : > { %p2122_p8 = pnand %p2120_p7, %p2110_p6 }
   0xe   : > { %p2123_p9 = pneg %p2122_p8 }
  0x10   : > { %p2130_p13 = pnand %p2129_p12, %p2123_p9 }
  0x12   : > { %2133 = shalt.err (!%p2130_p13)
}
  0x13   : > { %s2147_s30 = smov 64   ;;  %s2148_s8 = smov 4  }
  0x14   : > { %2030 = dma.hbm_to_vmem [thread:$0]  (!%p2028_p5), %s2468_s1, 3456, %s214_s27, [#allocation5], %s2147_s30, %s2147_s30, %s2148_s8  }
  0x15   : > { %252 = sbr.rel (%p2203_p2) target bundleno = 1180 (0x49c), region = 48 }
  0x1a   : > { %2139 = dma.done.wait (%p2031_p3), [#allocation5], 3456  }
  0x1b   : > { %2141 = vsyncadd (%p2031_p3), [#allocation5], 4294963840  ;;  %p283_p0 = scmp.lt.s32.totalorder %s2199_s25, 1  ;;  %v2149_v0 = vmov 0.0   ;;  %vm295_vm0 = vcmask 588800   ;;  %vm298_vm1 = vcmask 582656  }
  0x1c   : > { %1831 = vmatprep.subr.bf16.mxu0 %v2149_v0  ;;  %1845 = vmatprep.subr.bf16.mxu1 %v2149_v0  ;;  %296 = vst.msk [vmem:[#allocation2] sm:$0xff] %vm295_vm0, %v2149_v0  ;;  %297 = vst.msk [vmem:[#allocation2 + $0x8] sm:$0xff] %vm295_vm0, %v2149_v0  ;;  %vm2150_vm2 = vmmov 0   ;;  %vm376_vm3 = vcmask 1043456   ;;  %s2151_s15 = smov 4   ;;  %v2050_v5 = vld [vmem:[#allocation4 + $0x60] sm:$0xff]  }
  0x1d   : > { %s2477_s25 = smov (!%p283_p0, %s2199_s25), 1  ;;  %299 = vst.msk [vmem:[#allocation2 + $0x10] sm:$0x3] %vm298_vm1, %v2149_v0  ;;  %1841 = vmatprep.mubr.msk.bf16.mxu0 %vm2150_vm2, %v2149_v0  ;;  %1855 = vmatprep.mubr.msk.bf16.mxu1 %vm2150_vm2, %v2149_v0  ;;  %v2048_v3 = vld [vmem:[#allocation4 + $0x68] ss:$0 sps:$4 sm:$0xff]   ;;  %v2051_v8 = vld [vmem:[#allocation4 + $0x18] sm:$0xff]  }
  0x1e   : > { %s1750_s11 = sshll.u32 %s2477_s25, 4  ;;  %v2049_v4 = vld [vmem:[#allocation4 + $0x20] ss:$0 sps:$4 sm:$0xff]   ;;  %v378_v6 = vsel %vm376_vm3, %v2048_v3, 0  ;;  %v2052_v9 = vld [vmem:[#allocation4 + $0x58] sm:$0xff]   ;;  %v2053_v10 = vld [vmem:[#allocation4 + $0x10] sm:$0xff]  }
  0x1f   : > { %s287_s14 = scalar_lea.vmem %s2467_s0, %s1750_s11  ;;  %v452_v7 = vsel %vm376_vm3, %v2049_v4, 0  ;;  %1832 = vmatpush3.bf16.msra.mxu0 %v378_v6  ;;  %v2054_v11 = vld [vmem:[#allocation4 + $0x50] sm:$0xff]   ;;  %v2055_v12 = vld [vmem:[#allocation4 + $0x8] sm:$0xff]   ;;  %v2057_v14 = vld [vmem:[#allocation4] sm:$0xff]   ;;  %vm308_vm4 = vcmask 556064   ;;  %vm834_vm5 = vcmask 130048  }
  0x20   : > { %v293_v1 = vld [vmem:[%s287_s14] sm:$0xff]  ;;  %v294_v2 = vld [vmem:[%s287_s14 + $0x8] sm:$0xff]  ;;  %1846 = vmatpush3.bf16.msra.mxu1 %v452_v7  ;;  %1833 = vmatprep.subr.bf16.mxu0 %v2149_v0  ;;  %v2056_v13 = vld [vmem:[#allocation4 + $0x48] sm:$0xff]   ;;  %vm924_vm6 = vcmask 654336   ;;  %vm926_vm7 = vcmask 648192   ;;  %s2152_s21 = smov 8  }
  0x21   : > { %302 = vrot.lane.b32.xlu0 %v293_v1, %s2151_s15  ;;  %1847 = vmatprep.subr.bf16.mxu1 %v2149_v0  ;;  %v2058_v17 = vld [vmem:[#allocation4 + $0x8c] ss:$0 sps:$4 sm:$0xff]   ;;  %v2059_v18 = vld [vmem:[#allocation4 + $0x44] ss:$0 sps:$4 sm:$0xff]   ;;  %v2061_v28 = vld [vmem:[#allocation4 + $0x3c] sm:$0xff]   ;;  %925 = vst.msk [vmem:[#allocation3] sm:$0xff] %vm924_vm6, %v2149_v0 }
  0x22   : > { %v533_v25 = vsel %vm376_vm3, %v2058_v17, 0  ;;  %v604_v26 = vsel %vm376_vm3, %v2059_v18, 0  ;;  %v2060_v27 = vld [vmem:[#allocation4 + $0x84] sm:$0xff]   ;;  %v2062_v29 = vld [vmem:[#allocation4 + $0x7c] sm:$0xff]   ;;  %v2063_v30 = vld [vmem:[#allocation4 + $0x34] sm:$0xff]   ;;  %vm932_vm8 = vcmask 588864  }
  0x23   : > { %1834 = vmatpush3.bf16.msra.mxu0 %v2050_v5  ;;  %v2064_v31 = vld [vmem:[#allocation4 + $0x74] sm:$0xff]   ;;  %v2065_v32 = vld [vmem:[#allocation4 + $0x2c] sm:$0xff]   ;;  %v2067_v34 = vld [vmem:[#allocation4 + $0x24] sm:$0xff]   ;;  %927 = vst.msk [vmem:[#allocation3 + $0x8] sm:$0x3] %vm926_vm7, %v2149_v0  ;;  %vm1448_vm9 = vcmask 64512  }
  0x24   : > { %1848 = vmatpush3.bf16.msra.mxu1 %v2051_v8  ;;  %1835 = vmatprep.subr.bf16.mxu0 %v2149_v0  ;;  %v2066_v33 = vld [vmem:[#allocation4 + $0x6c] sm:$0xff]   ;;  %v2069_v36 = vld [vmem:[#allocation4 + $0xd4] ss:$0 sps:$4 sm:$0xff]   ;;  %v2072_v41 = vld [vmem:[#allocation4 + $0xa0] sm:$0xff]   ;;  %s1617_s28 = sshll.u32 %s2477_s25, 2  ;;  %vm1541_vm10 = vcmask 519168  }
  0x25   : > { %304 = vrot.lane.b32.xlu0 %v294_v2, %s2151_s15  ;;  %1849 = vmatprep.subr.bf16.mxu1 %v2149_v0  ;;  %v2068_v35 = vld [vmem:[#allocation4 + $0xb0] ss:$0 sps:$4 sm:$0xff]   ;;  %v774_v38 = vsel %vm376_vm3, %v2069_v36, 0  ;;  %v2070_v39 = vld [vmem:[#allocation4 + $0xa8] sm:$0xff]   ;;  %v2074_v43 = vld [vmem:[#allocation4 + $0x98] sm:$0xff]   ;;  %s291_s8 = scalar_lea.vmem %s2474_s7, %s1617_s28 }
  0x26   : > { %v691_v37 = vsel %vm376_vm3, %v2068_v35, 0  ;;  %v2071_v40 = vld [vmem:[#allocation4 + $0xcc] sm:$0xff]   ;;  %v2073_v42 = vld [vmem:[#allocation4 + $0xc4] sm:$0xff]   ;;  %v2075_v44 = vld [vmem:[#allocation4 + $0xbc] sm:$0xff]  }
  0x27   : > { %1836 = vmatpush3.bf16.msra.mxu0 %v2052_v9  ;;  %v2076_v45 = vld [vmem:[#allocation4 + $0x90] sm:$0xff]   ;;  %v2085_v36 = vld [vmem:[%s2471_s4 + $0x8] sm:$0xff]  }
  0x28   : > { %1850 = vmatpush3.bf16.msra.mxu1 %v2053_v10  ;;  %1837 = vmatprep.subr.bf16.mxu0 %v2149_v0  ;;  %v2077_v46 = vld [vmem:[#allocation4 + $0xb4] sm:$0xff]  }
  0x29   : > { %1851 = vmatprep.subr.bf16.mxu1 %v2149_v0  ;;  %v2084_v35 = vld [vmem:[%s2471_s4 + $0x58] sm:$0xff]  }
  0x2b   : > { %1838 = vmatpush3.bf16.msra.mxu0 %v2054_v11 }
  0x2c   : > { %1852 = vmatpush3.bf16.msra.mxu1 %v2055_v12  ;;  %1839 = vmatprep.subr.bf16.mxu0 %v2149_v0 }
  0x2d   : > { %1853 = vmatprep.subr.bf16.mxu1 %v2149_v0 }
  0x2f   : > { %1840 = vmatpush3.bf16.msra.mxu0 %v2056_v13 }
  0x30   : > { %1854 = vmatpush3.bf16.msra.mxu1 %v2057_v14  ;;  %1859 = vmatprep.subr.bf16.mxu0 %v2149_v0  ;;  %v1654_v14 = vld [vmem:[%s2469_s2] ss:$0 sm:$0xff] }
  0x31   : > { %1873 = vmatprep.subr.bf16.mxu1 %v2149_v0 }
  0x93   : > { %v303_v15 = vpop.permute.xlu0 %302 }
  0x94   : > { %309 = vst.msk [vmem:[#allocation2 + $0x1] sm:$0xff] %vm308_vm4, %v303_v15 }
  0x97   : > { %v305_v16 = vpop.permute.xlu0 %304 }
  0x98   : > { %310 = vst.msk [vmem:[#allocation2 + $0x9] sm:$0xff] %vm308_vm4, %v305_v16 }
  0x9b   : > { %v333_v19 = vld [vmem:[#allocation2 + $0x1] sm:$0xff] }
  0x9c   : > { %v311_v21 = vld [vmem:[#allocation2] sm:$0xff] }
  0x9f   : > { %v334_v20 = vld [vmem:[#allocation2 + $0x9] sm:$0xff] }
  0xa0   : > { %v312_v22 = vld [vmem:[#allocation2 + $0x8] sm:$0xff]  ;;  %v335_v23 = vpack.c.bf16 %v334_v20, %v333_v19 }
  0xa1   : > { %v313_v24 = vpack.c.bf16 %v312_v22, %v311_v21  ;;  %v647_v47 = vld [vmem:[#allocation2 + $0x2] sm:$0xff]  ;;  %v648_v48 = vld [vmem:[#allocation2 + $0xa] sm:$0xff] }
  0xa2   : > { %1842 = vmatmul.mubr.msk.bf16.vlgmr.msra.gmra.mxu0 %vm295_vm0, %v335_v23  ;;  %v649_v49 = vpack.c.bf16 %v648_v48, %v647_v47 }
  0xa3   : > { %1856 = vmatmul.mubr.msk.bf16.vlgmr.msra.gmra.mxu1 %vm295_vm0, %v313_v24  ;;  %1860 = vmatpush3.bf16.msra.mxu0 %v533_v25 }
  0xa4   : > { %1874 = vmatpush3.bf16.msra.mxu1 %v604_v26  ;;  %1861 = vmatprep.subr.bf16.mxu0 %v2149_v0 }
  0xa5   : > { %1875 = vmatprep.subr.bf16.mxu1 %v2149_v0  ;;  %1869 = vmatprep.mubr.msk.bf16.mxu0 %vm2150_vm2, %v2149_v0 }
  0xa6   : > { %1883 = vmatprep.mubr.msk.bf16.mxu1 %vm2150_vm2, %v2149_v0 }
  0xa7   : > { %1862 = vmatpush3.bf16.msra.mxu0 %v2060_v27  ;;  %v833_v27 = vld [vmem:[%s2470_s3] sm:$0xf] }
  0xa8   : > { %1876 = vmatpush3.bf16.msra.mxu1 %v2061_v28  ;;  %1863 = vmatprep.subr.bf16.mxu0 %v2149_v0  ;;  %v1656_v28 = vld [vmem:[%s2470_s3 + $0x4] sm:$0xf] }
  0xa9   : > { %1877 = vmatprep.subr.bf16.mxu1 %v2149_v0 }
  0xab   : > { %1864 = vmatpush3.bf16.msra.mxu0 %v2062_v29  ;;  %v2078_v29 = vld [vmem:[%s2471_s4 + $0x70] sm:$0xff]  }
  0xac   : > { %1878 = vmatpush3.bf16.msra.mxu1 %v2063_v30  ;;  %1865 = vmatprep.subr.bf16.mxu0 %v2149_v0  ;;  %v2079_v30 = vld [vmem:[%s2471_s4 + $0x20] sm:$0xff]  }
  0xad   : > { %1879 = vmatprep.subr.bf16.mxu1 %v2149_v0 }
  0xaf   : > { %1866 = vmatpush3.bf16.msra.mxu0 %v2064_v31  ;;  %v2080_v31 = vld [vmem:[%s2471_s4 + $0x68] sm:$0xff]  }
  0xb0   : > { %1880 = vmatpush3.bf16.msra.mxu1 %v2065_v32  ;;  %1867 = vmatprep.subr.bf16.mxu0 %v2149_v0  ;;  %v2081_v32 = vld [vmem:[%s2471_s4 + $0x18] sm:$0xff]  }
  0xb1   : > { %1881 = vmatprep.subr.bf16.mxu1 %v2149_v0 }
  0xb3   : > { %1868 = vmatpush3.bf16.msra.mxu0 %v2066_v33  ;;  %v2082_v33 = vld [vmem:[%s2471_s4 + $0x60] sm:$0xff]  }
  0xb4   : > { %1882 = vmatpush3.bf16.msra.mxu1 %v2067_v34  ;;  %1887 = vmatprep.subr.bf16.mxu0 %v2149_v0  ;;  %v2083_v34 = vld [vmem:[%s2471_s4 + $0x10] sm:$0xff]  }
  0xb5   : > { %1901 = vmatprep.subr.bf16.mxu1 %v2149_v0 }
  0xb6   : > { %1870 = vmatmul.mubr.msk.bf16.vlgmr.msra.gmra.mxu0 %vm295_vm0, %v335_v23 }
  0xb7   : > { %1884 = vmatmul.mubr.msk.bf16.vlgmr.msra.gmra.mxu1 %vm295_vm0, %v313_v24  ;;  %1888 = vmatpush3.bf16.msra.mxu0 %v691_v37  ;;  %v2086_v37 = vld [vmem:[%s2471_s4 + $0x50] sm:$0xff]  }
  0xb8   : > { %1902 = vmatpush3.bf16.msra.mxu1 %v774_v38  ;;  %1889 = vmatprep.subr.bf16.mxu0 %v2149_v0  ;;  %v2087_v38 = vld [vmem:[%s2471_s4] sm:$0xff]  }
  0xb9   : > { %1903 = vmatprep.subr.bf16.mxu1 %v2149_v0  ;;  %1897 = vmatprep.mubr.msk.bf16.mxu0 %vm2150_vm2, %v2149_v0 }
  0xba   : > { %1911 = vmatprep.mubr.msk.bf16.mxu1 %vm2150_vm2, %v2149_v0 }
  0xbb   : > { %1890 = vmatpush3.bf16.msra.mxu0 %v2070_v39 }
  0xbc   : > { %1904 = vmatpush3.bf16.msra.mxu1 %v2071_v40  ;;  %1891 = vmatprep.subr.bf16.mxu0 %v2149_v0 }
  0xbd   : > { %1905 = vmatprep.subr.bf16.mxu1 %v2149_v0 }
  0xbf   : > { %1892 = vmatpush3.bf16.msra.mxu0 %v2072_v41 }
  0xc0   : > { %1906 = vmatpush3.bf16.msra.mxu1 %v2073_v42  ;;  %1893 = vmatprep.subr.bf16.mxu0 %v2149_v0 }
  0xc1   : > { %1907 = vmatprep.subr.bf16.mxu1 %v2149_v0 }
  0xc3   : > { %1894 = vmatpush3.bf16.msra.mxu0 %v2074_v43 }
  0xc4   : > { %1908 = vmatpush3.bf16.msra.mxu1 %v2075_v44  ;;  %1895 = vmatprep.subr.bf16.mxu0 %v2149_v0 }
  0xc5   : > { %1909 = vmatprep.subr.bf16.mxu1 %v2149_v0 }
  0xc7   : > { %1896 = vmatpush3.bf16.msra.mxu0 %v2076_v45 }
  0xc8   : > { %1910 = vmatpush3.bf16.msra.mxu1 %v2077_v46  ;;  %1915 = vmatprep.subr.bf16.mxu0 %v2149_v0 }
  0xc9   : > { %1921 = vmatprep.subr.bf16.mxu1 %v2149_v0 }
  0xca   : > { %1898 = vmatmul.mubr.msk.bf16.vlgmr.msra.gmra.mxu0 %vm295_vm0, %v649_v49 }
  0xcb   : > { %1912 = vmatmul.mubr.msk.bf16.vlgmr.msra.gmra.mxu1 %vm295_vm0, %v649_v49  ;;  %1917 = vmatprep.mubr.msk.bf16.mxu0 %vm2150_vm2, %v2149_v0  ;;  %v2088_v49 = vld [vmem:[%s2471_s4 + $0x98] sm:$0xff]  }
  0xcc   : > { %1923 = vmatprep.mubr.msk.bf16.mxu1 %vm2150_vm2, %v2149_v0 }
 0x162   : > { %v414_v50 = vpop.f32.mrf.mxu0 }
 0x163   : > { %v488_v51 = vpop.f32.mrf.mxu1 }
 0x164   : > { %v1843_v52 = vpop.f32.mrf.mxu0  ;;  %v489_v3 = vadd.f32 %v488_v51, %v414_v50 }
 0x165   : > { %v1857_v53 = vpop.f32.mrf.mxu1  ;;  %v2089_v52 = vld [vmem:[%s2471_s4 + $0x48] sm:$0xff]  }
 0x166   : > { %v417_v54 = vpop.f32.mrf.mxu0 }
 0x167   : > { %v491_v55 = vpop.f32.mrf.mxu1 }
 0x168   : > { %v1844_v56 = vpop.f32.mrf.mxu0  ;;  %v492_v11 = vadd.f32 %v491_v55, %v417_v54  ;;  %v2090_v55 = vld [vmem:[%s2471_s4 + $0x90] sm:$0xff]  }
 0x169   : > { %v1858_v57 = vpop.f32.mrf.mxu1  ;;  %v2091_v56 = vld [vmem:[%s2471_s4 + $0x40] sm:$0xff]  }
 0x16a   : > { %v2092_v57 = vld [vmem:[%s2471_s4 + $0x88] sm:$0xff]  }
 0x176   : > { %v569_v58 = vpop.f32.mrf.mxu0 }
 0x177   : > { %v640_v59 = vpop.f32.mrf.mxu1 }
 0x178   : > { %v1871_v60 = vpop.f32.mrf.mxu0  ;;  %v641_v4 = vadd.f32 %v640_v59, %v569_v58  ;;  %v2093_v58 = vld [vmem:[%s2471_s4 + $0x38] sm:$0xff]   ;;  %v2094_v59 = vld [vmem:[%s2471_s4 + $0x80] sm:$0xff]  }
 0x179   : > { %v1885_v61 = vpop.f32.mrf.mxu1  ;;  %v2095_v60 = vld [vmem:[%s2471_s4 + $0x30] sm:$0xff]  }
 0x17a   : > { %v572_v62 = vpop.f32.mrf.mxu0  ;;  %v2096_v61 = vld [vmem:[%s2471_s4 + $0x78] sm:$0xff]  }
 0x17b   : > { %v643_v63 = vpop.f32.mrf.mxu1 }
 0x17c   : > { %v1872_v1 = vpop.f32.mrf.mxu0  ;;  %v644_v12 = vadd.f32 %v643_v63, %v572_v62  ;;  %v2097_v62 = vld [vmem:[%s2471_s4 + $0x28] sm:$0xff]   ;;  %v2098_v63 = vld [vmem:[%s2471_s4 + $0xc0] sm:$0xff]  }
 0x17d   : > { %v1886_v2 = vpop.f32.mrf.mxu1  ;;  %v2099_v1 = vld [vmem:[%s2471_s4 + $0xe8] sm:$0xff]  }
 0x17e   : > { %v2100_v2 = vld [vmem:[%s2471_s4 + $0xb8] sm:$0xff]  }
 0x18a   : > { %v727_v5 = vpop.f32.mrf.mxu0 }
 0x18b   : > { %v810_v6 = vpop.f32.mrf.mxu1  ;;  %v734_v7 = vadd.f32 %v727_v5, %v489_v3  ;;  %v2101_v3 = vld [vmem:[%s2471_s4 + $0xe0] sm:$0xff]   ;;  %v2103_v5 = vld [vmem:[%s2471_s4 + $0xd8] sm:$0xff]  }
 0x18c   : > { %v817_v8 = vadd.f32 %v810_v6, %v641_v4  ;;  %v1899_v9 = vpop.f32.mrf.mxu0  ;;  %v2102_v4 = vld [vmem:[%s2471_s4 + $0xb0] sm:$0xff]   ;;  %v2104_v6 = vld [vmem:[%s2471_s4 + $0xa8] sm:$0xff]  }
 0x18d   : > { %v1913_v10 = vpop.f32.mrf.mxu1  ;;  %v2107_v9 = vld [vmem:[%s2471_s4 + $0xc8] sm:$0xff]  }
 0x18e   : > { %v819_v13 = vmax.f32 %v734_v7, %v817_v8  ;;  %v730_v15 = vpop.f32.mrf.mxu0  ;;  %v2105_v7 = vld [vmem:[%s2471_s4 + $0xd0] sm:$0xff]   ;;  %v2106_v8 = vld [vmem:[%s2471_s4 + $0xa0] sm:$0xff]  }
 0x18f   : > { %v813_v16 = vpop.f32.mrf.mxu1  ;;  %v735_v17 = vadd.f32 %v730_v15, %v492_v11 }
 0x190   : > { %v818_v18 = vadd.f32 %v813_v16, %v644_v12  ;;  %v1900_v19 = vpop.f32.mrf.mxu0  ;;  %v828_v21 = vadd.f32 %v1654_v14, %v819_v13 }
 0x191   : > { %v1914_v20 = vpop.f32.mrf.mxu1 }
 0x192   : > { %v820_v22 = vmax.f32 %v735_v17, %v818_v18  ;;  %v830_v24 = vmax.f32 %v828_v21, 0.0 }
 0x194   : > { %v829_v23 = vadd.f32 %v1654_v14, %v820_v22 }
 0x196   : > { %v831_v25 = vmax.f32 %v829_v23, 0.0 }
 0x198   : > { %v832_v26 = vpack.c.bf16 %v831_v25, %v830_v24 }
 0x19a   : > { %1916 = vmatpush3.bf16.msra.mxu0 %v832_v26  ;;  %1922 = vmatpush3.bf16.msra.mxu1 %v832_v26 }
 0x19b   : > { %1927 = vmatprep.subr.bf16.mxu0 %v2149_v0  ;;  %1941 = vmatprep.subr.bf16.mxu1 %v2149_v0 }
 0x19d   : > { %1918 = vmatmul.mubr.msk.bf16.vlgmr.msra.gmra.mxu0 %vm834_vm5, %v833_v27  ;;  %1924 = vmatmul.mubr.msk.bf16.vlgmr.msra.gmra.mxu1 %vm834_vm5, %v1656_v28 }
 0x19e   : > { %1937 = vmatprep.mubr.msk.bf16.mxu0 %vm2150_vm2, %v2149_v0  ;;  %1951 = vmatprep.mubr.msk.bf16.mxu1 %vm2150_vm2, %v2149_v0 }
 0x19f   : > { %1928 = vmatpush3.bf16.msra.mxu0 %v2078_v29  ;;  %1942 = vmatpush3.bf16.msra.mxu1 %v2079_v30 }
 0x1a0   : > { %1929 = vmatprep.subr.bf16.mxu0 %v2149_v0  ;;  %1943 = vmatprep.subr.bf16.mxu1 %v2149_v0 }
 0x1a3   : > { %1930 = vmatpush3.bf16.msra.mxu0 %v2080_v31  ;;  %1944 = vmatpush3.bf16.msra.mxu1 %v2081_v32 }
 0x1a4   : > { %1931 = vmatprep.subr.bf16.mxu0 %v2149_v0  ;;  %1945 = vmatprep.subr.bf16.mxu1 %v2149_v0 }
 0x1a7   : > { %1932 = vmatpush3.bf16.msra.mxu0 %v2082_v33  ;;  %1946 = vmatpush3.bf16.msra.mxu1 %v2083_v34  ;;  %v1744_v33 = vld [vmem:[%s2472_s5] ss:$0 sm:$0xff] }
 0x1a8   : > { %1933 = vmatprep.subr.bf16.mxu0 %v2149_v0  ;;  %1947 = vmatprep.subr.bf16.mxu1 %v2149_v0 }
 0x1ab   : > { %1934 = vmatpush3.bf16.msra.mxu0 %v2084_v35  ;;  %1948 = vmatpush3.bf16.msra.mxu1 %v2085_v36 }
 0x1ac   : > { %1935 = vmatprep.subr.bf16.mxu0 %v2149_v0  ;;  %1949 = vmatprep.subr.bf16.mxu1 %v2149_v0 }
 0x1af   : > { %1936 = vmatpush3.bf16.msra.mxu0 %v2086_v37  ;;  %1950 = vmatpush3.bf16.msra.mxu1 %v2087_v38 }
 0x1b0   : > { %1955 = vmatprep.subr.bf16.mxu0 %v2149_v0  ;;  %1969 = vmatprep.subr.bf16.mxu1 %v2149_v0 }
 0x25d   : > { %v872_v39 = vpop.f32.mrf.mxu0  ;;  %v917_v40 = vpop.f32.mrf.mxu1 }
 0x25e   : > { %v923_v41 = vmax.f32 %v872_v39, %v917_v40 }
 0x25f   : > { %v1919_v42 = vpop.f32.mrf.mxu0  ;;  %v1925_v43 = vpop.f32.mrf.mxu1 }
 0x260   : > { %929 = vrot.lane.b32.xlu1 %v923_v41, %s2152_s21 }
 0x261   : > { %v875_v44 = vpop.f32.mrf.mxu0  ;;  %v920_v45 = vpop.f32.mrf.mxu1 }
 0x262   : > { %v1447_v45 = vld [vmem:[%s2473_s6] sm:$0x3] }
 0x263   : > { %v1920_v46 = vpop.f32.mrf.mxu0  ;;  %v1926_v47 = vpop.f32.mrf.mxu1 }
 0x264   : > { %v1746_v46 = vld [vmem:[%s2473_s6 + $0x2] sm:$0x3] }
 0x2d2   : > { %v930_v48 = vpop.permute.xlu1 %929 }
 0x2d3   : > { %933 = vst.msk [vmem:[#allocation3 + $0x1] sm:$0xff] %vm932_vm8, %v930_v48 }
 0x2da   : > { %v957_v50 = vld [vmem:[#allocation3 + $0x1] sm:$0xff] }
 0x2db   : > { %v934_v51 = vld [vmem:[#allocation3] sm:$0xff]  ;;  %v958_v53 = vpack.c.bf16 %v957_v50, %v957_v50 }
 0x2dc   : > { %v935_v54 = vpack.c.bf16 %v934_v51, %v934_v51  ;;  %v1267_v10 = vld [vmem:[#allocation3 + $0x2] sm:$0xff] }
 0x2dd   : > { %1938 = vmatmul.mubr.msk.bf16.vlgmr.msra.gmra.mxu0 %vm924_vm6, %v958_v53  ;;  %v1268_v11 = vpack.c.bf16 %v1267_v10, %v1267_v10 }
 0x2de   : > { %1952 = vmatmul.mubr.msk.bf16.vlgmr.msra.gmra.mxu1 %vm924_vm6, %v935_v54  ;;  %1956 = vmatpush3.bf16.msra.mxu0 %v2088_v49 }
 0x2df   : > { %1970 = vmatpush3.bf16.msra.mxu1 %v2089_v52  ;;  %1957 = vmatprep.subr.bf16.mxu0 %v2149_v0 }
 0x2e0   : > { %1971 = vmatprep.subr.bf16.mxu1 %v2149_v0  ;;  %1965 = vmatprep.mubr.msk.bf16.mxu0 %vm2150_vm2, %v2149_v0 }
 0x2e1   : > { %1979 = vmatprep.mubr.msk.bf16.mxu1 %vm2150_vm2, %v2149_v0 }
 0x2e2   : > { %1958 = vmatpush3.bf16.msra.mxu0 %v2090_v55 }
 0x2e3   : > { %1972 = vmatpush3.bf16.msra.mxu1 %v2091_v56  ;;  %1959 = vmatprep.subr.bf16.mxu0 %v2149_v0 }
 0x2e4   : > { %1973 = vmatprep.subr.bf16.mxu1 %v2149_v0 }
 0x2e6   : > { %1960 = vmatpush3.bf16.msra.mxu0 %v2092_v57 }
 0x2e7   : > { %1974 = vmatpush3.bf16.msra.mxu1 %v2093_v58  ;;  %1961 = vmatprep.subr.bf16.mxu0 %v2149_v0 }
 0x2e8   : > { %1975 = vmatprep.subr.bf16.mxu1 %v2149_v0 }
 0x2ea   : > { %1962 = vmatpush3.bf16.msra.mxu0 %v2094_v59 }
 0x2eb   : > { %1976 = vmatpush3.bf16.msra.mxu1 %v2095_v60  ;;  %1963 = vmatprep.subr.bf16.mxu0 %v2149_v0 }
 0x2ec   : > { %1977 = vmatprep.subr.bf16.mxu1 %v2149_v0 }
 0x2ee   : > { %1964 = vmatpush3.bf16.msra.mxu0 %v2096_v61 }
 0x2ef   : > { %1978 = vmatpush3.bf16.msra.mxu1 %v2097_v62  ;;  %1983 = vmatprep.subr.bf16.mxu0 %v2149_v0 }
 0x2f0   : > { %1997 = vmatprep.subr.bf16.mxu1 %v2149_v0 }
 0x2f1   : > { %1966 = vmatmul.mubr.msk.bf16.vlgmr.msra.gmra.mxu0 %vm924_vm6, %v958_v53 }
 0x2f2   : > { %1980 = vmatmul.mubr.msk.bf16.vlgmr.msra.gmra.mxu1 %vm924_vm6, %v935_v54  ;;  %1984 = vmatpush3.bf16.msra.mxu0 %v2098_v63 }
 0x2f3   : > { %1998 = vmatpush3.bf16.msra.mxu1 %v2099_v1  ;;  %1985 = vmatprep.subr.bf16.mxu0 %v2149_v0 }
 0x2f4   : > { %1999 = vmatprep.subr.bf16.mxu1 %v2149_v0  ;;  %1993 = vmatprep.mubr.msk.bf16.mxu0 %vm2150_vm2, %v2149_v0 }
 0x2f5   : > { %2007 = vmatprep.mubr.msk.bf16.mxu1 %vm2150_vm2, %v2149_v0 }
 0x2f6   : > { %1986 = vmatpush3.bf16.msra.mxu0 %v2100_v2 }
 0x2f7   : > { %2000 = vmatpush3.bf16.msra.mxu1 %v2101_v3  ;;  %1987 = vmatprep.subr.bf16.mxu0 %v2149_v0 }
 0x2f8   : > { %2001 = vmatprep.subr.bf16.mxu1 %v2149_v0 }
 0x2fa   : > { %1988 = vmatpush3.bf16.msra.mxu0 %v2102_v4 }
 0x2fb   : > { %2002 = vmatpush3.bf16.msra.mxu1 %v2103_v5  ;;  %1989 = vmatprep.subr.bf16.mxu0 %v2149_v0 }
 0x2fc   : > { %2003 = vmatprep.subr.bf16.mxu1 %v2149_v0 }
 0x2fe   : > { %1990 = vmatpush3.bf16.msra.mxu0 %v2104_v6 }
 0x2ff   : > { %2004 = vmatpush3.bf16.msra.mxu1 %v2105_v7  ;;  %1991 = vmatprep.subr.bf16.mxu0 %v2149_v0 }
 0x300   : > { %2005 = vmatprep.subr.bf16.mxu1 %v2149_v0 }
 0x302   : > { %1992 = vmatpush3.bf16.msra.mxu0 %v2106_v8 }
 0x303   : > { %2006 = vmatpush3.bf16.msra.mxu1 %v2107_v9  ;;  %2011 = vmatprep.subr.bf16.mxu0 %v2149_v0 }
 0x304   : > { %2017 = vmatprep.subr.bf16.mxu1 %v2149_v0 }
 0x305   : > { %1994 = vmatmul.mubr.msk.bf16.vlgmr.msra.gmra.mxu0 %vm924_vm6, %v1268_v11 }
 0x306   : > { %2008 = vmatmul.mubr.msk.bf16.vlgmr.msra.gmra.mxu1 %vm924_vm6, %v1268_v11  ;;  %2013 = vmatprep.mubr.msk.bf16.mxu0 %vm2150_vm2, %v2149_v0 }
 0x307   : > { %2019 = vmatprep.mubr.msk.bf16.mxu1 %vm2150_vm2, %v2149_v0 }
 0x39d   : > { %v1037_v12 = vpop.f32.mrf.mxu0 }
 0x39e   : > { %v1110_v13 = vpop.f32.mrf.mxu1 }
 0x39f   : > { %v1939_v14 = vpop.f32.mrf.mxu0  ;;  %v1111_v28 = vadd.f32 %v1110_v13, %v1037_v12 }
 0x3a0   : > { %v1953_v15 = vpop.f32.mrf.mxu1 }
 0x3a1   : > { %v1040_v16 = vpop.f32.mrf.mxu0 }
 0x3a2   : > { %v1113_v17 = vpop.f32.mrf.mxu1 }
 0x3a3   : > { %v1940_v18 = vpop.f32.mrf.mxu0 }
 0x3a4   : > { %v1954_v19 = vpop.f32.mrf.mxu1 }
 0x3b1   : > { %v1191_v20 = vpop.f32.mrf.mxu0 }
 0x3b2   : > { %v1261_v21 = vpop.f32.mrf.mxu1 }
 0x3b3   : > { %v1967_v22 = vpop.f32.mrf.mxu0  ;;  %v1262_v29 = vadd.f32 %v1261_v21, %v1191_v20 }
 0x3b4   : > { %v1981_v23 = vpop.f32.mrf.mxu1 }
 0x3b5   : > { %v1194_v24 = vpop.f32.mrf.mxu0 }
 0x3b6   : > { %v1264_v25 = vpop.f32.mrf.mxu1 }
 0x3b7   : > { %v1968_v26 = vpop.f32.mrf.mxu0 }
 0x3b8   : > { %v1982_v27 = vpop.f32.mrf.mxu1 }
 0x3c5   : > { %v1347_v30 = vpop.f32.mrf.mxu0 }
 0x3c6   : > { %v1429_v0 = vpop.f32.mrf.mxu1  ;;  %v1353_v31 = vadd.f32 %v1347_v30, %v1111_v28 }
 0x3c7   : > { %v1435_v32 = vadd.f32 %v1429_v0, %v1262_v29  ;;  %v1995_v34 = vpop.f32.mrf.mxu0 }
 0x3c8   : > { %v2009_v35 = vpop.f32.mrf.mxu1 }
 0x3c9   : > { %v1436_v36 = vmax.f32 %v1353_v31, %v1435_v32  ;;  %v1350_v37 = vpop.f32.mrf.mxu0 }
 0x3ca   : > { %v1432_v38 = vpop.f32.mrf.mxu1 }
 0x3cb   : > { %v1444_v39 = vadd.f32 %v1744_v33, %v1436_v36  ;;  %v1996_v40 = vpop.f32.mrf.mxu0 }
 0x3cc   : > { %v2010_v41 = vpop.f32.mrf.mxu1 }
 0x3cd   : > { %v1445_v42 = vmax.f32 %v1444_v39, 0.0 }
 0x3cf   : > { %v1446_v43 = vpack.c.bf16 %v1445_v42, %v1445_v42 }
 0x3d1   : > { %v1453_v44 = vsel %vm376_vm3, %v1446_v43, 0 }
 0x3d2   : > { %2012 = vmatpush3.bf16.msra.mxu0 %v1453_v44  ;;  %2018 = vmatpush3.bf16.msra.mxu1 %v1453_v44 }
 0x3d5   : > { %2014 = vmatmul.mubr.msk.bf16.vlgmr.msra.gmra.mxu0 %vm1448_vm9, %v1447_v45  ;;  %2020 = vmatmul.mubr.msk.bf16.vlgmr.msra.gmra.mxu1 %vm1448_vm9, %v1746_v46 }
 0x495   : > { %v1489_v47 = vpop.f32.mrf.mxu0  ;;  %v1534_v48 = vpop.f32.mrf.mxu1 }
 0x496   : > { %v1540_v49 = vmax.f32 %v1489_v47, %v1534_v48 }
 0x497   : > { %v2015_v50 = vpop.f32.mrf.mxu0  ;;  %v2021_v51 = vpop.f32.mrf.mxu1 }
 0x498   : > { %1542 = vst.msk [vmem:[%s291_s8] sm:$0xf] %vm1541_vm10, %v1540_v49 }
 0x499   : > { %v1492_v52 = vpop.f32.mrf.mxu0  ;;  %v1537_v53 = vpop.f32.mrf.mxu1 }
 0x49b   : > { %v2016_v54 = vpop.f32.mrf.mxu0  ;;  %v2022_v55 = vpop.f32.mrf.mxu1 }
 0x49c PF: > { %s18_s24 = sadd.s32 1, %s2144_s24  }
 0x49d   : > { %p15_p1 = scmp.ge.s32.totalorder %s18_s24, 4  }
 0x49f   :  { %17 = sbr.rel (!%p15_p1) target bundleno = 1 (0x1), region = 95 }
 0x4a4   :  { %1562 = vsyncpa [#allocation5], 1 }
 0x4a5   :  { %1564 = vsyncpa [#allocation5 + $0x1], 1 }

</bundles_post_ra>
